<compile_context>
chip_gen: v7x
topology: tpu7x:2x2x1
jax: 0.10.0
libtpu: 0.0.40
codegen_flags: <defaults>
</compile_context>

<pallas_src>
import math

import jax
import jax.numpy as jnp
from jax.experimental import pallas as pl
from jax.experimental.pallas import tpu as pltpu


def make_pe_buffer(d_model: int, max_len: int = 5000) -> jnp.ndarray:
    """Deterministic construction of the `pe` buffer, same formula as __init__."""
    position = jnp.arange(max_len, dtype=jnp.float32)[:, None]            # [max_len, 1]
    div_term = jnp.exp(
        jnp.arange(0, d_model, 2, dtype=jnp.float32) * (-math.log(10000.0) / d_model)
    )                                                                     # [d_model//2]
    pe = jnp.zeros((max_len, 1, d_model), dtype=jnp.float32)
    pe = pe.at[:, 0, 0::2].set(jnp.sin(position * div_term))
    pe = pe.at[:, 0, 1::2].set(jnp.cos(position * div_term))
    return pe


def _round_down(x: int, unit: int) -> int:
    return (x // unit) * unit


def _vmem_capacity_bytes() -> int:
    """Physical VMEM of the current generation; conservative fallback if unknown."""
    try:
        return int(pltpu.get_tpu_info().vmem_capacity_bytes)
    except Exception:
        return 64 << 20  # assume the smallest (v7x per-TC) if the query fails


def _choose_blocks(S: int, BD: int, itemsize: int, *, target_bytes: int,
                   sublane_unit: int, min_seq_tiles: int = 2):
    """Pick (seq_tile, lane_tile).

    Tiles are dtype-aligned (sublane_unit x 128) but need NOT divide the array
    evenly — Pallas handles ragged last blocks — so awkward shapes never fall
    back to a single full-extent block.
    """
    # Lane axis (flattened batch * d_model): multiple of 128, or the full extent.
    if BD % 128 != 0 or BD * itemsize <= target_bytes:
        tl = BD
    else:
        tl = max(128, _round_down(min(BD, target_bytes // itemsize), 128))

    # Seq axis (sublanes): multiple of the dtype-aware sublane unit, or full extent.
    if S <= sublane_unit:
        ts = S
    else:
        rows = max(sublane_unit, target_bytes // max(tl * itemsize, 1))
        ts = max(sublane_unit, _round_down(min(S, rows), sublane_unit))
        # Megacore balance (v7x has 2 TensorCores): aim for >= min_seq_tiles tiles.
        if min_seq_tiles > 1 and S >= min_seq_tiles * sublane_unit:
            cap = max(sublane_unit,
                      _round_down(pl.cdiv(S, min_seq_tiles), sublane_unit))
            ts = min(ts, cap)
    return ts, tl


def _pe_add_kernel(x_ref, pe_ref, o_ref):
    # x_ref : (ts, tl) lane-dense tile of x (seq on sublanes, B*D on lanes)
    # pe_ref: (1, tl)  positional-encoding row chunk (resident over inner axis)
    # Single VPU add, broadcast over the seq (sublane) axis — HBM-bound; the
    # body is already 1 vld + 1 add + 1 vst per vreg, nothing else to optimize.
    o_ref[...] = x_ref[...] + pe_ref[...]


def positional_encoding_forward(
    x: jnp.ndarray,
    pe: jnp.ndarray,
    *,
    use_pallas: bool | None = None,
    min_pallas_bytes: int = 2 << 20,
    donate_x: bool = False,
) -> jnp.ndarray:
    """x: [seq_len, batch, d_model] -> [seq_len, batch, d_model].

    If `donate_x=True`, the output aliases x's HBM buffer; pair the enclosing
    jit with donate_argnums for x, otherwise XLA inserts a defensive copy.
    """
    S, B, D = x.shape
    assert B <= pe.shape[0], (
        f"pe has only {pe.shape[0]} rows but batch={B}; pe[:batch] would be short"
    )
    BD = B * D
    # pe[:x.size(0)] in PyTorch is taken *after* swapaxes, i.e. pe[:batch],
    # broadcast over seq. Flattened row-major it lines up with x's (B, D) axes.
    # (Cast to x.dtype; PyTorch would promote bf16 x to fp32 — negligible here.)
    pe_row = pe[:B, 0, :].reshape(1, BD).astype(x.dtype)      # [1, B*D] lane-dense

    if use_pallas is None:
        use_pallas = x.size * x.dtype.itemsize >= min_pallas_bytes
    if not use_pallas:
        # Tiny inputs: custom-call overhead dwarfs the work; let XLA fuse it.
        return x + pe_row.reshape(1, B, D)

    x2d = x.reshape(S, BD)
    itemsize = x.dtype.itemsize
    sublane_unit = 8 * max(1, 4 // itemsize)      # 8 f32, 16 bf16, 32 int8/fp8

    # Generation-aware per-block target: 4-8 MiB, but never let the in-flight
    # set (2 input + 2 output blocks) exceed ~3/4 of physical VMEM (v7x: 64 MiB).
    vmem_cap = _vmem_capacity_bytes()
    target_bytes = max(2 << 20, min(8 << 20, (vmem_cap * 3 // 4) // 4))

    ts, tl = _choose_blocks(S, BD, itemsize, target_bytes=target_bytes,
                            sublane_unit=sublane_unit, min_seq_tiles=2)
    block_bytes = ts * tl * itemsize
    # 2x input + 2x output blocks + double-buffered pe row + headroom;
    # explicit so v5e's 16 MiB scoped default doesn't reject the larger tiles.
    vmem_limit = int(min(vmem_cap,
                         max(16 << 20, 4 * block_bytes + 2 * tl * itemsize + (4 << 20))))

    # Lane tiles outermost, seq tiles innermost: pe's block index is constant
    # over the whole inner loop, so it is re-DMA'd only grid[0] times.
    grid = (pl.cdiv(BD, tl), pl.cdiv(S, ts))

    out2d = pl.pallas_call(
        _pe_add_kernel,
        out_shape=jax.ShapeDtypeStruct((S, BD), x.dtype),
        grid_spec=pltpu.PrefetchScalarGridSpec(
            num_scalar_prefetch=0,
            grid=grid,
            in_specs=[
                pl.BlockSpec((ts, tl), lambda j, i: (i, j)),
                pl.BlockSpec((1, tl), lambda j, i: (0, j)),
            ],
            out_specs=pl.BlockSpec((ts, tl), lambda j, i: (i, j)),
        ),
        compiler_params=pltpu.CompilerParams(
            dimension_semantics=("parallel", "parallel"),
            vmem_limit_bytes=vmem_limit,
        ),
        input_output_aliases=({0: 0} if donate_x else {}),
    )(x2d, pe_row)

    # TODO(synk): training-mode dropout (stochastic, p=0.1) not implemented;
    # eval-mode semantics (identity) are used, matching module.eval().
    return out2d.reshape(S, B, D)


def _reference(x, pe):
    xb = jnp.swapaxes(x, 0, 1)          # [B, S, D]
    xb = xb + pe[: xb.shape[0]]         # pe[:B] -> [B, 1, D], broadcast over seq
    return jnp.swapaxes(xb, 0, 1)       # [S, B, D]


if __name__ == "__main__":
    key = jax.random.PRNGKey(0)
    k1, k2, k3 = jax.random.split(key, 3)

    # Small shape implied by the module (seq=8, batch=2, d_model=32): force the
    # Pallas path so the kernel itself is exercised and checked.
    S1, B1, D1 = 8, 2, 32
    x_small = jax.random.normal(k1, (S1, B1, D1), dtype=jnp.float32)
    pe_small = make_pe_buffer(D1, max_len=64)
    out_small = jax.block_until_ready(
        positional_encoding_forward(x_small, pe_small, use_pallas=True)
    )
    assert out_small.shape == (S1, B1, D1)
    assert jnp.allclose(out_small, _reference(x_small, pe_small),
                        atol=1e-6, rtol=1e-6), "small mismatch"

    # Ragged shape (seq not a multiple of 8): exercises dtype-aligned tiles with
    # a ragged last block instead of the old full-extent fallback.
    S2, B2, D2 = 100, 2, 64
    x_rag = jax.random.normal(k2, (S2, B2, D2), dtype=jnp.float32)
    pe_rag = make_pe_buffer(D2, max_len=64)
    out_rag = jax.block_until_ready(
        positional_encoding_forward(x_rag, pe_rag, use_pallas=True)
    )
    assert out_rag.shape == (S2, B2, D2)
    assert jnp.allclose(out_rag, _reference(x_rag, pe_rag),
                        atol=1e-6, rtol=1e-6), "ragged mismatch"

    # Larger shape: exercises real seq tiling (grid > 1), lane-dense HBM
    # streaming with ~4 MiB blocks and double-buffered prefetch/writeback.
    S3, B3, D3 = 1024, 8, 256
    x_big = jax.random.normal(k3, (S3, B3, D3), dtype=jnp.float32)
    pe_big = make_pe_buffer(D3, max_len=64)
    out_big = jax.block_until_ready(positional_encoding_forward(x_big, pe_big))
    assert out_big.shape == (S3, B3, D3)
    assert jnp.allclose(out_big, _reference(x_big, pe_big),
                        atol=1e-6, rtol=1e-6), "large mismatch"

    print("KERNEL_OK")
</pallas_src>

<mosaic_0001>
module attributes {stable_mosaic.version = 11 : i64} {
  func.func @_pe_add_kernel(%arg0: i32, %arg1: i32, %arg2: memref<8x64xf32, #tpu.memory_space<vmem>>, %arg3: memref<1x64xf32, #tpu.memory_space<vmem>>, %arg4: memref<8x64xf32, #tpu.memory_space<vmem>>) attributes {dimension_semantics = [#tpu.dimension_semantics<parallel>, #tpu.dimension_semantics<parallel>], iteration_bounds = array<i64: 1, 1>, scalar_prefetch = 0 : i64, scratch_operands = 0 : i64, tpu.core_type = #tpu.core_type<tc>, window_params = [{transform_indices = @transform_0, window_bounds = array<i64: 8, 64>}, {transform_indices = @transform_1, window_bounds = array<i64: 1, 64>}, {transform_indices = @transform_2, window_bounds = array<i64: 8, 64>}]} {
    %c0 = arith.constant 0 : index
    %c0_0 = arith.constant 0 : index
    %0 = vector.load %arg2[%c0, %c0_0] : memref<8x64xf32, #tpu.memory_space<vmem>>, vector<8x64xf32>
    %c0_1 = arith.constant 0 : index
    %c0_2 = arith.constant 0 : index
    %1 = vector.load %arg3[%c0_1, %c0_2] : memref<1x64xf32, #tpu.memory_space<vmem>>, vector<1x64xf32>
    %2 = vector.broadcast %1 : vector<1x64xf32> to vector<8x64xf32>
    %3 = arith.addf %0, %2 : vector<8x64xf32>
    %c0_3 = arith.constant 0 : index
    %c0_4 = arith.constant 0 : index
    %4 = vector.load %arg4[%c0_3, %c0_4] : memref<8x64xf32, #tpu.memory_space<vmem>>, vector<8x64xf32>
    tpu.vector_store %arg4[%c0_3, %c0_4], %3 {strides = array<i32>} : memref<8x64xf32, #tpu.memory_space<vmem>>, vector<8x64xf32>,
    return
  }
  func.func @transform_0(%arg0: i32, %arg1: i32) -> (i32, i32) {
    %c0_i32 = arith.constant 0 : i32
    return %arg1, %arg0 : i32, i32
  }
  func.func @transform_1(%arg0: i32, %arg1: i32) -> (i32, i32) {
    %c0_i32 = arith.constant 0 : i32
    %c0_i32_0 = arith.constant 0 : i32
    return %c0_i32, %arg0 : i32, i32
  }
  func.func @transform_2(%arg0: i32, %arg1: i32) -> (i32, i32) {
    %c0_i32 = arith.constant 0 : i32
    return %arg1, %arg0 : i32, i32
  }
}

</mosaic_0001>

<bundles_post_ra>
// kernel: tpu_custom_call.1
= control target key start
LH: loop header
LB: loop body
LE: loop exit
PB: predicated region body
PF: predicated region fallthrough
CT: control target
= control target key end

     0   :  { %7 = vsyncpa [#allocation3], 0  ;;  %s145_s0 = inlined_call_operand.hbm [shape: f32[8,64], index: 0, kind: input, shape index: {}]   ;;  %s146_s1 = inlined_call_operand.vmem [shape: f32[1,64], index: 1, kind: input, shape index: {}]   ;;  %s147_s2 = inlined_call_operand.hbm [shape: f32[8,64], index: 2, kind: output, shape index: {}]  }
   0x1   :  { %8 = vsyncpa [#allocation4], 0  ;;  %s101_s9 = smov [#allocation2]   ;;  %s53_s13 = scalar_lea.hbm %s145_s0, 128 }
   0x2   :  { %s15_s10 = sshll.u32 %s101_s9, 4  ;;  %p54_p0 = scmp.ne.s32.totalorder %s145_s0, %s53_s13  ;;  %s16_s10 = int_to_ptr.vmem [resolvable:$true] %s15_s10 }
   0x3   :  { %p57_p1 = scmp.lt.u32.totalorder %s53_s13, %s145_s0 }
   0x5   :  { %p59_p2 = pnand %p57_p1, %p54_p0 }
   0x7   :  { %62 = shalt.err (!%p59_p2)
}
   0x8   :  { %s63_s18 = scalar_lea.vmem %s16_s10, 128  ;;  %p68_p4 = scmp.lt.s32.totalorder %s16_s10, %s16_s10 }
   0x9   :  { %p64_p3 = scmp.ne.s32.totalorder %s16_s10, %s63_s18  ;;  %p69_p5 = scmp.lt.s32.totalorder %s63_s18, %s63_s18 }
   0xb   :  { %p70_p6 = por %p69_p5, %p68_p4 }
   0xd   :  { %p71_p7 = pnand %p70_p6, %p64_p3 }
   0xf   :  { %74 = shalt.err (!%p71_p7)
}
  0x10   :  { %18 = dma.hbm_to_vmem [thread:$0]  %s145_s0, 128, %s16_s10, [#allocation3]  }
  0x11   :  { %97 = dma.done.wait [#allocation3], 128  }
  0x12   :  { %98 = vsyncadd [#allocation3], 4294967168  ;;  %s102_s21 = smov [#allocation5]   ;;  %v24_v0 = vld [vmem:[#allocation2] sm:$0xff]  ;;  %vm33_vm0 = vcmask 523264  }
  0x13   :  { %s41_s22 = sshll.u32 %s102_s21, 4  ;;  %v50_v1 = vld [vmem:[%s146_s1] ss:$0 sm:$0xff]  ;;  %s42_s22 = int_to_ptr.vmem [resolvable:$true] %s41_s22 }
  0x14   :  { %v32_v2 = vadd.f32 %v50_v1, %v24_v0  ;;  %s75_s25 = scalar_lea.vmem %s42_s22, 128  ;;  %p80_p9 = scmp.lt.s32.totalorder %s42_s22, %s42_s22 }
  0x15   :  { %p76_p8 = scmp.ne.s32.totalorder %s42_s22, %s75_s25  ;;  %p81_p10 = scmp.lt.s32.totalorder %s75_s25, %s75_s25 }
  0x16   :  { %34 = vst.msk [vmem:[#allocation5] sm:$0xff] %vm33_vm0, %v32_v2 }
  0x17   :  { %p82_p11 = por %p81_p10, %p80_p9 }
  0x19   :  { %p83_p12 = pnand %p82_p11, %p76_p8 }
  0x1b   :  { %86 = shalt.err (!%p83_p12)
}
  0x1c   :  { %s87_s27 = scalar_lea.hbm %s147_s2, 128 }
  0x1d   :  { %p88_p13 = scmp.ne.s32.totalorder %s147_s2, %s87_s27  ;;  %p91_p0 = scmp.lt.u32.totalorder %s87_s27, %s147_s2 }
  0x1f   :  { %p93_p1 = pnand %p91_p0, %p88_p13 }
  0x21   :  { %96 = shalt.err (!%p93_p1)
}
  0x22   :  { %44 = dma.vmem_to_hbm [thread:$0]  %s42_s22, 128, %s147_s2, [#allocation4]  }
  0x23   :  { %99 = dma.done.wait [#allocation4], 128  }
  0x24   :  { %100 = vsyncadd [#allocation4], 4294967168 }
  0x25   :  { %48 = vsyncpa [#allocation3], 1 }
  0x26   :  { %49 = vsyncpa [#allocation4], 1 }

</bundles_post_ra>
